<compile_context>
chip_gen: v6e
topology: v6e:2x2x1
jax: 0.10.0
libtpu: 0.0.40
codegen_flags: <defaults>
</compile_context>

<pallas_src>
import math

import jax
import jax.numpy as jnp
from jax.experimental import pallas as pl
from jax.experimental.pallas import tpu as pltpu


def make_positional_encoding(d_model, max_len=5000, dtype=jnp.float32):
    """Deterministic sinusoidal table, shape (max_len, 1, d_model)."""
    position = jnp.arange(max_len, dtype=jnp.float32)[:, None]              # (max_len, 1)
    div_term = jnp.exp(
        jnp.arange(0, d_model, 2, dtype=jnp.float32) * -(math.log(10000.0) / d_model)
    )                                                                        # (ceil(d/2),)
    enc = jnp.zeros((max_len, d_model), jnp.float32)
    enc = enc.at[:, 0::2].set(jnp.sin(position * div_term))
    # Slice div_term for the cos branch so odd d_model is handled correctly.
    enc = enc.at[:, 1::2].set(jnp.cos(position * div_term[: d_model // 2]))
    # unsqueeze(0).transpose(0, 1)  ->  (max_len, 1, d_model)
    return enc[:, None, :].astype(dtype)


def _sublane_multiple(dtype):
    # f32 -> 8, bf16 -> 16, int8/fp8 -> 32 (rows per packed sublane tile).
    return max(8, 32 // jnp.dtype(dtype).itemsize)


def _choose_tile_s(S, bytes_per_row, dtype,
                   target_step_bytes=8 << 20, vmem_budget_bytes=24 << 20):
    """Pick a seq-axis tile: big enough to amortize the ~0.35us/step grid overhead,
    small enough that the double-buffered working set fits comfortably in scoped VMEM
    on all generations (incl. v7x's 64 MiB physical), and giving >= 2 grid steps when
    possible so the parallel axis can shard across v7x's two TensorCores."""
    sub = _sublane_multiple(dtype)
    max_rows_vmem = max(sub, vmem_budget_bytes // (2 * bytes_per_row))   # 2x: double buffer
    pref_rows = max(sub, target_step_bytes // bytes_per_row)
    ts = min(S, max_rows_vmem, pref_rows)
    if S >= 2 * sub:
        ts = min(ts, -(-S // 2))          # guarantee at least 2 grid steps
    if ts >= sub:
        ts = (ts // sub) * sub            # full-sublane tiles -> unmasked stores
    return int(max(1, min(ts, S)))


def positional_encoding_forward(x, encoding, tile_s=None):
    """x: (S, B, D); encoding: (max_len, 1, D); returns x + encoding[:S]."""
    S, B, D = x.shape
    max_len = encoding.shape[0]
    assert S <= max_len, f"seq_len {S} exceeds positional-encoding max_len {max_len}"
    assert encoding.shape[2] == D, "d_model mismatch between x and encoding"

    itemsize = jnp.dtype(x.dtype).itemsize

    # Free, contiguous reshape to a lane-dense 2-D layout: (S, B*D).
    x2 = x.reshape(S, B * D)
    enc2 = encoding[:S, 0, :].astype(x.dtype)                            # (S, D)

    # Per seq-row VMEM bytes per step: x tile + out tile + enc tile.
    bytes_per_row = (2 * B * D + D) * itemsize
    ts = _choose_tile_s(S, bytes_per_row, x.dtype) if tile_s is None else int(tile_s)
    grid = (pl.cdiv(S, ts),)

    working_set = 2 * ts * bytes_per_row                                  # double-buffered
    vmem_limit = int(min(32 << 20, max(16 << 20, working_set + working_set // 2)))

    def kernel(x_ref, enc_ref, o_ref):
        # x_ref/o_ref: (ts, B*D); enc_ref: (ts, D).
        # Replicate the per-position encoding across the B contiguous lane groups once
        # (static unroll, lane-axis concat), then do ONE full-width add + store.
        e = enc_ref[...]
        e_wide = e if B == 1 else jnp.concatenate([e] * B, axis=-1)      # (ts, B*D)
        o_ref[...] = x_ref[...] + e_wide

    out2 = pl.pallas_call(
        kernel,
        out_shape=jax.ShapeDtypeStruct((S, B * D), x.dtype),
        grid=grid,
        in_specs=[
            pl.BlockSpec((ts, B * D), lambda i: (i, 0)),   # last dim == full array dim
            pl.BlockSpec((ts, D), lambda i: (i, 0)),       # last dim == full array dim
        ],
        out_specs=pl.BlockSpec((ts, B * D), lambda i: (i, 0)),
        input_output_aliases={0: 0},          # add in place on x's HBM buffer when legal
        compiler_params=pltpu.CompilerParams(
            dimension_semantics=("parallel",),
            vmem_limit_bytes=vmem_limit,
        ),
    )(x2, enc2)
    return out2.reshape(S, B, D)


if __name__ == "__main__":
    root = jax.random.PRNGKey(0)
    k1, k2 = jax.random.split(root)

    fwd = jax.jit(positional_encoding_forward)

    # Case 1: small shape implied by the module (seq, batch, d_model) = (8, 2, 32).
    S1, B1, D1 = 8, 2, 32
    enc1 = make_positional_encoding(D1, max_len=64)
    x1 = jax.random.normal(k1, (S1, B1, D1), dtype=jnp.float32)
    ref1 = x1 + enc1[:S1]
    out1 = jax.block_until_ready(fwd(x1, enc1))
    assert out1.shape == x1.shape and out1.dtype == x1.dtype
    assert jnp.allclose(out1, ref1, atol=1e-6, rtol=1e-6)

    # Case 2: lane-dense, multi-step grid (exercises pipelining, >=2 grid steps,
    # and the batch broadcast across lane groups). Still small.
    S2, B2, D2 = 48, 4, 128
    enc2 = make_positional_encoding(D2, max_len=128)
    x2 = jax.random.normal(k2, (S2, B2, D2), dtype=jnp.float32)
    ref2 = x2 + enc2[:S2]
    out2 = jax.block_until_ready(fwd(x2, enc2))
    assert out2.shape == x2.shape and out2.dtype == x2.dtype
    assert jnp.allclose(out2, ref2, atol=1e-6, rtol=1e-6)

    print("KERNEL_OK")
</pallas_src>

<mosaic_0001>
module attributes {stable_mosaic.version = 11 : i64} {
  func.func @kernel(%arg0: i32, %arg1: memref<8x64xf32, #tpu.memory_space<vmem>>, %arg2: memref<8x32xf32, #tpu.memory_space<vmem>>, %arg3: memref<8x64xf32, #tpu.memory_space<vmem>>) attributes {dimension_semantics = [#tpu.dimension_semantics<parallel>], iteration_bounds = array<i64: 1>, scalar_prefetch = 0 : i64, scratch_operands = 0 : i64, tpu.core_type = #tpu.core_type<tc>, window_params = [{transform_indices = @transform_0, window_bounds = array<i64: 8, 64>}, {transform_indices = @transform_1, window_bounds = array<i64: 8, 32>}, {transform_indices = @transform_2, window_bounds = array<i64: 8, 64>}]} {
    %c0 = arith.constant 0 : index
    %c0_0 = arith.constant 0 : index
    %0 = vector.load %arg2[%c0, %c0_0] : memref<8x32xf32, #tpu.memory_space<vmem>>, vector<8x32xf32>
    %1 = tpu.concatenate %0, %0 in 1 : vector<8x32xf32>, vector<8x32xf32> -> vector<8x64xf32>
    %c0_1 = arith.constant 0 : index
    %c0_2 = arith.constant 0 : index
    %2 = vector.load %arg1[%c0_1, %c0_2] : memref<8x64xf32, #tpu.memory_space<vmem>>, vector<8x64xf32>
    %3 = arith.addf %2, %1 : vector<8x64xf32>
    %c0_3 = arith.constant 0 : index
    %c0_4 = arith.constant 0 : index
    %4 = vector.load %arg3[%c0_3, %c0_4] : memref<8x64xf32, #tpu.memory_space<vmem>>, vector<8x64xf32>
    tpu.vector_store %arg3[%c0_3, %c0_4], %3 {strides = array<i32>} : memref<8x64xf32, #tpu.memory_space<vmem>>, vector<8x64xf32>,
    return
  }
  func.func @transform_0(%arg0: i32) -> (i32, i32) {
    %c0_i32 = arith.constant 0 : i32
    %c0_i32_0 = arith.constant 0 : i32
    return %arg0, %c0_i32 : i32, i32
  }
  func.func @transform_1(%arg0: i32) -> (i32, i32) {
    %c0_i32 = arith.constant 0 : i32
    %c0_i32_0 = arith.constant 0 : i32
    return %arg0, %c0_i32 : i32, i32
  }
  func.func @transform_2(%arg0: i32) -> (i32, i32) {
    %c0_i32 = arith.constant 0 : i32
    %c0_i32_0 = arith.constant 0 : i32
    return %arg0, %c0_i32 : i32, i32
  }
}

</mosaic_0001>

<bundles_post_ra>
// kernel: positional_encoding_forward.1
= control target key start
LH: loop header
LB: loop body
LE: loop exit
PB: predicated region body
PF: predicated region fallthrough
CT: control target
= control target key end

     0   :  { %s27_s11 = smov 32   ;;  %vm16_vm0 = vcmask 261120   ;;  %vm20_vm1 = vcmask 523264   ;;  %s52_s1 = inlined_call_operand.vmem [shape: f32[8,32], index: 1, kind: input, shape index: {}]   ;;  %s53_s0 = inlined_call_operand.vmem [shape: f32[8,64], index: 0, kind: input, shape index: {}, may-alias: {0,2}]   ;;  %s54_s2 = inlined_call_operand.vmem [shape: f32[8,64], index: 2, kind: output, shape index: {}, may-alias: {0,2}]  }
   0x1   :  { %v11_v0 = vld [vmem:[%s52_s1] sm:$0xff] }
   0x2   :  { %13 = vrot.lane.b32.xlu0 %v11_v0, %s27_s11  ;;  %v18_v1 = vld [vmem:[%s53_s0] sm:$0xff] }
  0x74   :  { %v14_v2 = vpop.permute.xlu0 %13 }
  0x75   :  { %v17_v3 = vsel %vm16_vm0, %v11_v0, %v14_v2 }
  0x76   :  { %v19_v4 = vadd.f32 %v18_v1, %v17_v3 }
  0x78   :  { %21 = vst.msk [vmem:[%s54_s2] sm:$0xff] %vm20_vm1, %v19_v4 }

</bundles_post_ra>
